<compile_context>
chip_gen: v5e
topology: v5e:2x2
jax: 0.10.0
libtpu: 0.0.40
codegen_flags: <defaults>
</compile_context>

<pallas_src>
import math

import jax
import jax.numpy as jnp
from jax import lax
from jax.experimental import pallas as pl
from jax.experimental.pallas import tpu as pltpu

_LN_EPS = 1e-5  # GPT2Config.layer_norm_epsilon default
_SQRT_2_OVER_PI = math.sqrt(2.0 / math.pi)


# ----------------------------- in-kernel math helpers -----------------------------
def _layernorm(x, g, b):
    mu = jnp.mean(x, axis=-1, keepdims=True)
    xc = x - mu
    var = jnp.mean(xc * xc, axis=-1, keepdims=True)
    return xc * lax.rsqrt(var + _LN_EPS) * g + b


def _gelu_tanh(x):
    # TODO(synk): activation_function='gelu' in the torch spec is the exact erf-GELU; the
    # tanh approximation (max abs err ~3e-4) is used so the nonlinearity runs on the EUP
    # instead of a ~12-op/element VALU erf polynomial over the (T, 4E) tensor.
    return 0.5 * x * (1.0 + jnp.tanh(_SQRT_2_OVER_PI * (x + 0.044715 * (x * x * x))))


# ----------------------------- fused network kernel -----------------------------
def _make_fused_kernel(num_embed_linear, T, E, H):
    Dh = E // H
    scale = 1.0 / math.sqrt(Dh)
    neg = float(jnp.finfo(jnp.float32).min)  # torch.finfo(dtype).min mask value

    def kernel(*refs):
        idx = 0
        x_ref = refs[idx]; idx += 1
        embed_wb = refs[idx: idx + 2 * num_embed_linear]; idx += 2 * num_embed_linear
        wpe_ref = refs[idx]; idx += 1
        (ln1g, ln1b, wqkv, bqkv, wpr, bpr,
         ln2g, ln2b, wfc, bfc, wout, bout) = refs[idx: idx + 12]; idx += 12
        lnfg, lnfb = refs[idx], refs[idx + 1]; idx += 2
        o_ref = refs[idx]; idx += 1
        attn_buf = refs[idx]  # (T, E) f32 VMEM scratch for concatenated head outputs

        layer = pl.program_id(1)
        n_layers = pl.num_programs(1)

        # ---- layer 0: embedding MLP (Linear/ReLU stack) + position embeddings; seeds the
        #      VMEM-resident activation held in the revisited output block. Dropout is
        #      identity in eval mode.
        @pl.when(layer == 0)
        def _():
            h = x_ref[0]  # (T, F) f32
            for i in range(num_embed_linear):
                w = embed_wb[2 * i][...]        # bf16 (in, out)
                b = embed_wb[2 * i + 1][...]    # f32  (1, out)
                h = jnp.dot(h.astype(jnp.bfloat16), w,
                            preferred_element_type=jnp.float32) + b
                if i < num_embed_linear - 1:
                    h = jnp.maximum(h, 0.0)     # ReLU between hidden layers only
            o_ref[0] = h + wpe_ref[...]

        x = o_ref[0]  # (T, E) f32 — carried across the layer grid axis in VMEM

        # ---- attention sub-block (pre-LN) ----
        h = _layernorm(x, ln1g[...], ln1b[...])
        qkv = jnp.dot(h.astype(jnp.bfloat16), wqkv[...],
                      preferred_element_type=jnp.float32) + bqkv[...]
        q = qkv[:, 0:E] * scale
        k = qkv[:, E:2 * E]
        v = qkv[:, 2 * E:3 * E].astype(jnp.bfloat16)
        row = lax.broadcasted_iota(jnp.int32, (T, T), 0)
        col = lax.broadcasted_iota(jnp.int32, (T, T), 1)
        causal = col <= row
        # Static head loop (H is small); each head's output goes into its lane slice of
        # attn_buf so the output projection is a single full-E-contraction MXU matmul.
        for hh in range(H):
            sl = slice(hh * Dh, (hh + 1) * Dh)
            qh = q[:, sl].astype(jnp.bfloat16)
            kh = k[:, sl].astype(jnp.bfloat16)
            s = lax.dot_general(qh, kh, (((1,), (1,)), ((), ())),
                                preferred_element_type=jnp.float32)
            s = jnp.where(causal, s, neg)
            m = jnp.max(s, axis=-1, keepdims=True)
            e = jnp.exp(s - m)
            inv = pl.reciprocal(jnp.sum(e, axis=-1, keepdims=True), approx=True)
            p = (e * inv).astype(jnp.bfloat16)
            attn_buf[:, sl] = jnp.dot(p, v[:, sl], preferred_element_type=jnp.float32)
        attn = jnp.dot(attn_buf[...].astype(jnp.bfloat16), wpr[...],
                       preferred_element_type=jnp.float32) + bpr[...]
        x = x + attn

        # ---- MLP sub-block (pre-LN), n_inner = None -> 4*E, GELU ----
        h2 = _layernorm(x, ln2g[...], ln2b[...])
        ff = jnp.dot(h2.astype(jnp.bfloat16), wfc[...],
                     preferred_element_type=jnp.float32) + bfc[...]
        ff = _gelu_tanh(ff)
        ff = jnp.dot(ff.astype(jnp.bfloat16), wout[...],
                     preferred_element_type=jnp.float32) + bout[...]
        h_out = x + ff

        # ---- write back the resident activation; fold ln_f into the last layer ----
        is_last = layer == n_layers - 1

        @pl.when(is_last)
        def _():
            o_ref[0] = _layernorm(h_out, lnfg[...], lnfb[...])

        @pl.when(layer < n_layers - 1)
        def _():
            o_ref[0] = h_out

    return kernel


# ----------------------------- glue / forward -----------------------------
def ttx_character_net_forward(params, trajectory, hidden_state_indices=None, *, n_head):
    B, T, Fdim = trajectory.shape
    E = params["lnf_g"].shape[-1]
    L = params["w_qkv"].shape[0]
    n_embed = len(params["embed_w"])
    wpe_slice = params["wpe"][:T]

    args = [trajectory]
    in_specs = [pl.BlockSpec((1, T, Fdim), lambda b, l: (b, 0, 0))]
    # Embedding-MLP weights / biases + wpe + ln_f: constant-index (fetched once, stay
    # resident). NOTE: constant-index blocks could use pipeline_mode=pl.Buffered(1) to
    # halve their VMEM; left at default buffering for lowering robustness (they are tiny
    # relative to the streamed per-layer weights).
    for w, bia in zip(params["embed_w"], params["embed_b"]):
        args += [w, bia]
        in_specs += [pl.BlockSpec(tuple(w.shape), lambda b, l: (0, 0)),
                     pl.BlockSpec(tuple(bia.shape), lambda b, l: (0, 0))]
    args.append(wpe_slice)
    in_specs.append(pl.BlockSpec(tuple(wpe_slice.shape), lambda b, l: (0, 0)))

    # Stacked per-layer GPT-2 block parameters: leading [n_layer] dim is squeezed out of
    # the kernel ref; index_map (l, 0, 0) streams layer l's slab (double-buffered, so the
    # next layer's weights are DMA'd behind the current layer's matmuls).
    layer_keys = ["ln1_g", "ln1_b", "w_qkv", "b_qkv", "w_proj", "b_proj",
                  "ln2_g", "ln2_b", "w_fc", "b_fc", "w_out", "b_out"]
    for kname in layer_keys:
        a = params[kname]
        args.append(a)
        in_specs.append(pl.BlockSpec((None,) + tuple(a.shape[1:]),
                                     lambda b, l: (l, 0, 0)))
    for kname in ["lnf_g", "lnf_b"]:
        a = params[kname]
        args.append(a)
        in_specs.append(pl.BlockSpec(tuple(a.shape), lambda b, l: (0, 0)))

    out = pl.pallas_call(
        _make_fused_kernel(n_embed, T, E, n_head),
        out_shape=jax.ShapeDtypeStruct((B, T, E), jnp.float32),
        grid=(B, L),
        in_specs=in_specs,
        # Output block index depends only on b -> revisited (VMEM-resident) across the
        # layer axis; written back to HBM once per batch element.
        out_specs=pl.BlockSpec((1, T, E), lambda b, l: (b, 0, 0)),
        scratch_shapes=[pltpu.VMEM((T, E), jnp.float32)],
        compiler_params=pltpu.CompilerParams(
            dimension_semantics=("parallel", "arbitrary"),
            vmem_limit_bytes=64 * 1024 * 1024),
    )(*args)

    if hidden_state_indices is None:
        return out[:, None]  # matches torch x[:, None] when indices is None
    return out[:, hidden_state_indices]


# ----------------------------- parameters -----------------------------
def init_params(key, num_joint_agent_features, hidden_layer_features, embedding_size,
                n_layer, n_positions=1024):
    E = embedding_size
    dims = [num_joint_agent_features] + list(hidden_layer_features or []) + [E]
    k = key

    def nxt():
        nonlocal k
        k, sub = jax.random.split(k)
        return sub

    def w_init(shape, scale=0.02):
        return (scale * jax.random.normal(nxt(), shape, jnp.float32)).astype(jnp.bfloat16)

    params = {"embed_w": [], "embed_b": []}
    for i in range(len(dims) - 1):
        params["embed_w"].append(w_init((dims[i], dims[i + 1]), scale=0.1))
        params["embed_b"].append(0.02 * jax.random.normal(nxt(), (1, dims[i + 1]), jnp.float32))
    params["wpe"] = 0.02 * jax.random.normal(nxt(), (n_positions, E), jnp.float32)
    L = n_layer
    params.update({
        "ln1_g": jnp.ones((L, 1, E), jnp.float32), "ln1_b": jnp.zeros((L, 1, E), jnp.float32),
        "w_qkv": w_init((L, E, 3 * E)),
        "b_qkv": 0.02 * jax.random.normal(nxt(), (L, 1, 3 * E), jnp.float32),
        "w_proj": w_init((L, E, E)),
        "b_proj": 0.02 * jax.random.normal(nxt(), (L, 1, E), jnp.float32),
        "ln2_g": jnp.ones((L, 1, E), jnp.float32), "ln2_b": jnp.zeros((L, 1, E), jnp.float32),
        "w_fc": w_init((L, E, 4 * E)),
        "b_fc": 0.02 * jax.random.normal(nxt(), (L, 1, 4 * E), jnp.float32),
        "w_out": w_init((L, 4 * E, E)),
        "b_out": 0.02 * jax.random.normal(nxt(), (L, 1, E), jnp.float32),
        "lnf_g": jnp.ones((1, E), jnp.float32), "lnf_b": jnp.zeros((1, E), jnp.float32),
    })
    return params


# ----------------------------- pure-JAX reference (f32, exact erf-GELU) -----------------------------
def reference_forward(params, trajectory, hidden_state_indices, n_head):
    f32 = lambda a: a.astype(jnp.float32)
    h = trajectory
    ws, bs = params["embed_w"], params["embed_b"]
    for i, (w, b) in enumerate(zip(ws, bs)):
        h = h @ f32(w) + b
        if i < len(ws) - 1:
            h = jnp.maximum(h, 0.0)
    B, T, _ = trajectory.shape
    E = params["lnf_g"].shape[-1]
    H, Dh = n_head, E // n_head
    h = h + params["wpe"][:T][None]
    neg = jnp.finfo(jnp.float32).min
    causal = jnp.tril(jnp.ones((T, T), bool))
    L = params["w_qkv"].shape[0]
    for li in range(L):
        a_in = _layernorm(h, params["ln1_g"][li], params["ln1_b"][li])
        qkv = a_in @ f32(params["w_qkv"][li]) + params["b_qkv"][li]
        q, k, v = qkv[..., :E], qkv[..., E:2 * E], qkv[..., 2 * E:]
        split = lambda t: t.reshape(B, T, H, Dh).transpose(0, 2, 1, 3)
        q, k, v = split(q), split(k), split(v)
        s = jnp.einsum("bhqd,bhkd->bhqk", q, k) / math.sqrt(Dh)
        s = jnp.where(causal, s, neg)
        p = jax.nn.softmax(s, axis=-1)
        a = jnp.einsum("bhqk,bhkd->bhqd", p, v).transpose(0, 2, 1, 3).reshape(B, T, E)
        h = h + (a @ f32(params["w_proj"][li]) + params["b_proj"][li])
        m_in = _layernorm(h, params["ln2_g"][li], params["ln2_b"][li])
        ff = m_in @ f32(params["w_fc"][li]) + params["b_fc"][li]
        ff = 0.5 * ff * (1.0 + lax.erf(ff / math.sqrt(2.0)))  # exact erf-GELU ('gelu')
        h = h + (ff @ f32(params["w_out"][li]) + params["b_out"][li])
    h = _layernorm(h, params["lnf_g"], params["lnf_b"])
    return h[:, hidden_state_indices]


if __name__ == "__main__":
    # Small config consistent with the module: trajectory (B, T, num_joint_agent_features)
    B, T, F = 2, 8, 12
    hidden_layer_features = [24]
    E, n_layer, n_head = 32, 2, 2

    key = jax.random.PRNGKey(0)
    kp, kx = jax.random.split(key)
    params = init_params(kp, F, hidden_layer_features, E, n_layer)
    trajectory = jax.random.normal(kx, (B, T, F), jnp.float32)
    hidden_state_indices = jnp.array([2, T - 1], dtype=jnp.int32)

    out = ttx_character_net_forward(params, trajectory, hidden_state_indices, n_head=n_head)
    out = jax.block_until_ready(out)
    assert out.shape == (B, hidden_state_indices.shape[0], E)

    # Tolerance covers bf16 matmul operands, approx reciprocal and tanh-GELU vs the
    # full-f32 erf-GELU reference; structural bugs would produce O(1) errors.
    ref = reference_forward(params, trajectory, hidden_state_indices, n_head)
    err = float(jnp.max(jnp.abs(out - ref)))
    assert jnp.allclose(out, ref, atol=3e-2, rtol=3e-2), f"max abs err {err}"
    print("KERNEL_OK")
</pallas_src>

<mosaic_0001>
module attributes {stable_mosaic.version = 11 : i64} {
  func.func @kernel(%arg0: i32, %arg1: i32, %arg2: memref<1x8x12xf32, #tpu.memory_space<vmem>>, %arg3: memref<12x24xbf16, #tpu.memory_space<vmem>>, %arg4: memref<1x24xf32, #tpu.memory_space<vmem>>, %arg5: memref<24x32xbf16, #tpu.memory_space<vmem>>, %arg6: memref<1x32xf32, #tpu.memory_space<vmem>>, %arg7: memref<8x32xf32, #tpu.memory_space<vmem>>, %arg8: memref<1x1x32xf32, #tpu.memory_space<vmem>>, %arg9: memref<1x1x32xf32, #tpu.memory_space<vmem>>, %arg10: memref<1x32x96xbf16, #tpu.memory_space<vmem>>, %arg11: memref<1x1x96xf32, #tpu.memory_space<vmem>>, %arg12: memref<1x32x32xbf16, #tpu.memory_space<vmem>>, %arg13: memref<1x1x32xf32, #tpu.memory_space<vmem>>, %arg14: memref<1x1x32xf32, #tpu.memory_space<vmem>>, %arg15: memref<1x1x32xf32, #tpu.memory_space<vmem>>, %arg16: memref<1x32x128xbf16, #tpu.memory_space<vmem>>, %arg17: memref<1x1x128xf32, #tpu.memory_space<vmem>>, %arg18: memref<1x128x32xbf16, #tpu.memory_space<vmem>>, %arg19: memref<1x1x32xf32, #tpu.memory_space<vmem>>, %arg20: memref<1x32xf32, #tpu.memory_space<vmem>>, %arg21: memref<1x32xf32, #tpu.memory_space<vmem>>, %arg22: memref<1x8x32xf32, #tpu.memory_space<vmem>>, %arg23: memref<8x32xf32, #tpu.memory_space<vmem>>) attributes {dimension_semantics = [#tpu.dimension_semantics<parallel>, #tpu.dimension_semantics<arbitrary>], iteration_bounds = array<i64: 2, 2>, scalar_prefetch = 0 : i64, scratch_operands = 1 : i64, tpu.core_type = #tpu.core_type<tc>, window_params = [{transform_indices = @transform_0, window_bounds = array<i64: 1, 8, 12>}, {pipeline_mode = #tpu.pipeline_mode<synchronous>, transform_indices = @transform_1, window_bounds = array<i64: 12, 24>}, {pipeline_mode = #tpu.pipeline_mode<synchronous>, transform_indices = @transform_2, window_bounds = array<i64: 1, 24>}, {pipeline_mode = #tpu.pipeline_mode<synchronous>, transform_indices = @transform_3, window_bounds = array<i64: 24, 32>}, {pipeline_mode = #tpu.pipeline_mode<synchronous>, transform_indices = @transform_4, window_bounds = array<i64: 1, 32>}, {pipeline_mode = #tpu.pipeline_mode<synchronous>, transform_indices = @transform_5, window_bounds = array<i64: 8, 32>}, {transform_indices = @transform_6, window_bounds = array<i64: 1, 1, 32>}, {transform_indices = @transform_7, window_bounds = array<i64: 1, 1, 32>}, {transform_indices = @transform_8, window_bounds = array<i64: 1, 32, 96>}, {transform_indices = @transform_9, window_bounds = array<i64: 1, 1, 96>}, {transform_indices = @transform_10, window_bounds = array<i64: 1, 32, 32>}, {transform_indices = @transform_11, window_bounds = array<i64: 1, 1, 32>}, {transform_indices = @transform_12, window_bounds = array<i64: 1, 1, 32>}, {transform_indices = @transform_13, window_bounds = array<i64: 1, 1, 32>}, {transform_indices = @transform_14, window_bounds = array<i64: 1, 32, 128>}, {transform_indices = @transform_15, window_bounds = array<i64: 1, 1, 128>}, {transform_indices = @transform_16, window_bounds = array<i64: 1, 128, 32>}, {transform_indices = @transform_17, window_bounds = array<i64: 1, 1, 32>}, {pipeline_mode = #tpu.pipeline_mode<synchronous>, transform_indices = @transform_18, window_bounds = array<i64: 1, 32>}, {pipeline_mode = #tpu.pipeline_mode<synchronous>, transform_indices = @transform_19, window_bounds = array<i64: 1, 32>}, {transform_indices = @transform_20, window_bounds = array<i64: 1, 8, 32>}]} {
    %c0_i32 = arith.constant 0 : i32
    %0 = arith.cmpi eq, %arg1, %c0_i32 : i32
    %1 = arith.extui %0 : i1 to i32
    %c0_i32_0 = arith.constant 0 : i32
    %2 = arith.cmpi ne, %1, %c0_i32_0 : i32
    scf.if %2 {
      %c0_75 = arith.constant 0 : index
      %c0_76 = arith.constant 0 : index
      %c0_77 = arith.constant 0 : index
      %158 = vector.load %arg2[%c0_75, %c0_76, %c0_77] : memref<1x8x12xf32, #tpu.memory_space<vmem>>, vector<1x8x12xf32>
      %159 = vector.shape_cast %158 : vector<1x8x12xf32> to vector<8x12xf32>
      %c0_78 = arith.constant 0 : index
      %c0_79 = arith.constant 0 : index
      %160 = vector.load %arg3[%c0_78, %c0_79] : memref<12x24xbf16, #tpu.memory_space<vmem>>, vector<12x24xbf16>
      %c0_80 = arith.constant 0 : index
      %c0_81 = arith.constant 0 : index
      %161 = vector.load %arg4[%c0_80, %c0_81] : memref<1x24xf32, #tpu.memory_space<vmem>>, vector<1x24xf32>
      %162 = arith.truncf %159 : vector<8x12xf32> to vector<8x12xbf16>
      %cst_82 = arith.constant dense<0.000000e+00> : vector<8x24xf32>
      %163 = tpu.matmul %162, %160, %cst_82 {dimension_numbers = #tpu.dot_dimension_numbers<[1], [0], [0], [1], [0, 0, 1, 1], [], []>} : vector<8x12xbf16>, vector<12x24xbf16>, vector<8x24xf32> -> vector<8x24xf32>
      %164 = vector.broadcast %161 : vector<1x24xf32> to vector<8x24xf32>
      %165 = arith.addf %163, %164 : vector<8x24xf32>
      %cst_83 = arith.constant 0.000000e+00 : f32
      %166 = vector.broadcast %cst_83 : f32 to vector<8x24xf32>
      %167 = arith.maximumf %165, %166 : vector<8x24xf32>
      %c0_84 = arith.constant 0 : index
      %c0_85 = arith.constant 0 : index
      %168 = vector.load %arg5[%c0_84, %c0_85] : memref<24x32xbf16, #tpu.memory_space<vmem>>, vector<24x32xbf16>
      %c0_86 = arith.constant 0 : index
      %c0_87 = arith.constant 0 : index
      %169 = vector.load %arg6[%c0_86, %c0_87] : memref<1x32xf32, #tpu.memory_space<vmem>>, vector<1x32xf32>
      %170 = arith.truncf %167 : vector<8x24xf32> to vector<8x24xbf16>
      %cst_88 = arith.constant dense<0.000000e+00> : vector<8x32xf32>
      %171 = tpu.matmul %170, %168, %cst_88 {dimension_numbers = #tpu.dot_dimension_numbers<[1], [0], [0], [1], [0, 0, 1, 1], [], []>} : vector<8x24xbf16>, vector<24x32xbf16>, vector<8x32xf32> -> vector<8x32xf32>
      %172 = vector.broadcast %169 : vector<1x32xf32> to vector<8x32xf32>
      %173 = arith.addf %171, %172 : vector<8x32xf32>
      %c0_89 = arith.constant 0 : index
      %c0_90 = arith.constant 0 : index
      %174 = vector.load %arg7[%c0_89, %c0_90] : memref<8x32xf32, #tpu.memory_space<vmem>>, vector<8x32xf32>
      %175 = arith.addf %173, %174 : vector<8x32xf32>
      %c0_91 = arith.constant 0 : index
      %c0_92 = arith.constant 0 : index
      %c0_93 = arith.constant 0 : index
      %176 = vector.load %arg22[%c0_91, %c0_92, %c0_93] : memref<1x8x32xf32, #tpu.memory_space<vmem>>, vector<1x8x32xf32>
      %177 = vector.shape_cast %176 : vector<1x8x32xf32> to vector<8x32xf32>
      %178 = vector.shape_cast %175 : vector<8x32xf32> to vector<1x8x32xf32>
      tpu.vector_store %arg22[%c0_91, %c0_92, %c0_93], %178 {strides = array<i32>} : memref<1x8x32xf32, #tpu.memory_space<vmem>>, vector<1x8x32xf32>,
    } else {
    }
    %c0 = arith.constant 0 : index
    %c0_1 = arith.constant 0 : index
    %c0_2 = arith.constant 0 : index
    %3 = vector.load %arg22[%c0, %c0_1, %c0_2] : memref<1x8x32xf32, #tpu.memory_space<vmem>>, vector<1x8x32xf32>
    %4 = vector.shape_cast %3 : vector<1x8x32xf32> to vector<8x32xf32>
    %c0_3 = arith.constant 0 : index
    %c0_4 = arith.constant 0 : index
    %c0_5 = arith.constant 0 : index
    %5 = vector.load %arg8[%c0_3, %c0_4, %c0_5] : memref<1x1x32xf32, #tpu.memory_space<vmem>>, vector<1x1x32xf32>
    %6 = vector.shape_cast %5 : vector<1x1x32xf32> to vector<1x32xf32>
    %c0_6 = arith.constant 0 : index
    %c0_7 = arith.constant 0 : index
    %c0_8 = arith.constant 0 : index
    %7 = vector.load %arg9[%c0_6, %c0_7, %c0_8] : memref<1x1x32xf32, #tpu.memory_space<vmem>>, vector<1x1x32xf32>
    %8 = vector.shape_cast %7 : vector<1x1x32xf32> to vector<1x32xf32>
    %cst = arith.constant dense<0.000000e+00> : vector<8xf32>
    %9 = vector.multi_reduction <add>, %4, %cst [1] : vector<8x32xf32> to vector<8xf32>
    %10 = vector.shape_cast %9 : vector<8xf32> to vector<8x1xf32>
    %cst_9 = arith.constant 3.200000e+01 : f32
    %11 = vector.broadcast %cst_9 : f32 to vector<8x1xf32>
    %12 = arith.divf %10, %11 : vector<8x1xf32>
    %13 = vector.broadcast %12 : vector<8x1xf32> to vector<8x32xf32>
    %14 = arith.subf %4, %13 : vector<8x32xf32>
    %15 = arith.mulf %14, %14 : vector<8x32xf32>
    %cst_10 = arith.constant dense<0.000000e+00> : vector<8xf32>
    %16 = vector.multi_reduction <add>, %15, %cst_10 [1] : vector<8x32xf32> to vector<8xf32>
    %17 = vector.shape_cast %16 : vector<8xf32> to vector<8x1xf32>
    %cst_11 = arith.constant 3.200000e+01 : f32
    %18 = vector.broadcast %cst_11 : f32 to vector<8x1xf32>
    %19 = arith.divf %17, %18 : vector<8x1xf32>
    %cst_12 = arith.constant 9.99999974E-6 : f32
    %20 = vector.broadcast %cst_12 : f32 to vector<8x1xf32>
    %21 = arith.addf %19, %20 : vector<8x1xf32>
    %22 = math.rsqrt %21 : vector<8x1xf32>
    %23 = vector.broadcast %22 : vector<8x1xf32> to vector<8x32xf32>
    %24 = arith.mulf %14, %23 : vector<8x32xf32>
    %25 = vector.broadcast %6 : vector<1x32xf32> to vector<8x32xf32>
    %26 = arith.mulf %24, %25 : vector<8x32xf32>
    %27 = vector.broadcast %8 : vector<1x32xf32> to vector<8x32xf32>
    %28 = arith.addf %26, %27 : vector<8x32xf32>
    %29 = arith.truncf %28 : vector<8x32xf32> to vector<8x32xbf16>
    %c0_13 = arith.constant 0 : index
    %c0_14 = arith.constant 0 : index
    %c0_15 = arith.constant 0 : index
    %30 = vector.load %arg10[%c0_13, %c0_14, %c0_15] : memref<1x32x96xbf16, #tpu.memory_space<vmem>>, vector<1x32x96xbf16>
    %31 = vector.shape_cast %30 : vector<1x32x96xbf16> to vector<32x96xbf16>
    %cst_16 = arith.constant dense<0.000000e+00> : vector<8x96xf32>
    %32 = tpu.matmul %29, %31, %cst_16 {dimension_numbers = #tpu.dot_dimension_numbers<[1], [0], [0], [1], [0, 0, 1, 1], [], []>} : vector<8x32xbf16>, vector<32x96xbf16>, vector<8x96xf32> -> vector<8x96xf32>
    %c0_17 = arith.constant 0 : index
    %c0_18 = arith.constant 0 : index
    %c0_19 = arith.constant 0 : index
    %33 = vector.load %arg11[%c0_17, %c0_18, %c0_19] : memref<1x1x96xf32, #tpu.memory_space<vmem>>, vector<1x1x96xf32>
    %34 = vector.shape_cast %33 : vector<1x1x96xf32> to vector<1x96xf32>
    %35 = vector.broadcast %34 : vector<1x96xf32> to vector<8x96xf32>
    %36 = arith.addf %32, %35 : vector<8x96xf32>
    %37 = vector.extract_strided_slice %36 {offsets = [0, 0], sizes = [8, 32], strides = [1, 1]} : vector<8x96xf32> to vector<8x32xf32>
    %cst_20 = arith.constant 2.500000e-01 : f32
    %38 = vector.broadcast %cst_20 : f32 to vector<8x32xf32>
    %39 = arith.mulf %37, %38 : vector<8x32xf32>
    %40 = vector.extract_strided_slice %36 {offsets = [0, 32], sizes = [8, 32], strides = [1, 1]} : vector<8x96xf32> to vector<8x32xf32>
    %41 = vector.extract_strided_slice %36 {offsets = [0, 64], sizes = [8, 32], strides = [1, 1]} : vector<8x96xf32> to vector<8x32xf32>
    %42 = arith.truncf %41 : vector<8x32xf32> to vector<8x32xbf16>
    %43 = tpu.iota {dimensions = array<i32: 0>} : vector<8x8xi32>
    %44 = tpu.iota {dimensions = array<i32: 1>} : vector<8x8xi32>
    %45 = arith.cmpi sle, %44, %43 : vector<8x8xi32>
    %46 = vector.extract_strided_slice %39 {offsets = [0, 0], sizes = [8, 16], strides = [1, 1]} : vector<8x32xf32> to vector<8x16xf32>
    %47 = arith.truncf %46 : vector<8x16xf32> to vector<8x16xbf16>
    %48 = vector.extract_strided_slice %40 {offsets = [0, 0], sizes = [8, 16], strides = [1, 1]} : vector<8x32xf32> to vector<8x16xf32>
    %49 = arith.truncf %48 : vector<8x16xf32> to vector<8x16xbf16>
    %cst_21 = arith.constant dense<0.000000e+00> : vector<8x8xf32>
    %50 = tpu.matmul %47, %49, %cst_21 {dimension_numbers = #tpu.dot_dimension_numbers<[1], [1], [0], [0], [0, 0, 1, 0], [], []>} : vector<8x16xbf16>, vector<8x16xbf16>, vector<8x8xf32> -> vector<8x8xf32>
    %cst_22 = arith.constant -3.40282347E+38 : f32
    %51 = vector.broadcast %cst_22 : f32 to vector<8x8xf32>
    %52 = arith.select %45, %50, %51 : vector<8x8xi1>, vector<8x8xf32>
    %cst_23 = arith.constant dense<0xFF800000> : vector<8xf32>
    %53 = vector.multi_reduction <maximumf>, %52, %cst_23 [1] : vector<8x8xf32> to vector<8xf32>
    %54 = vector.shape_cast %53 : vector<8xf32> to vector<8x1xf32>
    %55 = vector.broadcast %54 : vector<8x1xf32> to vector<8x8xf32>
    %56 = arith.subf %52, %55 : vector<8x8xf32>
    %57 = math.exp %56 : vector<8x8xf32>
    %cst_24 = arith.constant dense<0.000000e+00> : vector<8xf32>
    %58 = vector.multi_reduction <add>, %57, %cst_24 [1] : vector<8x8xf32> to vector<8xf32>
    %59 = vector.shape_cast %58 : vector<8xf32> to vector<8x1xf32>
    %60 = tpu.reciprocal %59 {approx = true} : vector<8x1xf32> -> vector<8x1xf32>
    %61 = vector.broadcast %60 : vector<8x1xf32> to vector<8x8xf32>
    %62 = arith.mulf %57, %61 : vector<8x8xf32>
    %63 = arith.truncf %62 : vector<8x8xf32> to vector<8x8xbf16>
    %64 = vector.extract_strided_slice %42 {offsets = [0, 0], sizes = [8, 16], strides = [1, 1]} : vector<8x32xbf16> to vector<8x16xbf16>
    %cst_25 = arith.constant dense<0.000000e+00> : vector<8x16xf32>
    %65 = tpu.matmul %63, %64, %cst_25 {dimension_numbers = #tpu.dot_dimension_numbers<[1], [0], [0], [1], [0, 0, 1, 1], [], []>} : vector<8x8xbf16>, vector<8x16xbf16>, vector<8x16xf32> -> vector<8x16xf32>
    %c0_26 = arith.constant 0 : index
    %c0_27 = arith.constant 0 : index
    %66 = vector.load %arg23[%c0_26, %c0_27] : memref<8x32xf32, #tpu.memory_space<vmem>>, vector<8x16xf32>
    tpu.vector_store %arg23[%c0_26, %c0_27], %65 {strides = array<i32>} : memref<8x32xf32, #tpu.memory_space<vmem>>, vector<8x16xf32>,
    %67 = vector.extract_strided_slice %39 {offsets = [0, 16], sizes = [8, 16], strides = [1, 1]} : vector<8x32xf32> to vector<8x16xf32>
    %68 = arith.truncf %67 : vector<8x16xf32> to vector<8x16xbf16>
    %69 = vector.extract_strided_slice %40 {offsets = [0, 16], sizes = [8, 16], strides = [1, 1]} : vector<8x32xf32> to vector<8x16xf32>
    %70 = arith.truncf %69 : vector<8x16xf32> to vector<8x16xbf16>
    %cst_28 = arith.constant dense<0.000000e+00> : vector<8x8xf32>
    %71 = tpu.matmul %68, %70, %cst_28 {dimension_numbers = #tpu.dot_dimension_numbers<[1], [1], [0], [0], [0, 0, 1, 0], [], []>} : vector<8x16xbf16>, vector<8x16xbf16>, vector<8x8xf32> -> vector<8x8xf32>
    %cst_29 = arith.constant -3.40282347E+38 : f32
    %72 = vector.broadcast %cst_29 : f32 to vector<8x8xf32>
    %73 = arith.select %45, %71, %72 : vector<8x8xi1>, vector<8x8xf32>
    %cst_30 = arith.constant dense<0xFF800000> : vector<8xf32>
    %74 = vector.multi_reduction <maximumf>, %73, %cst_30 [1] : vector<8x8xf32> to vector<8xf32>
    %75 = vector.shape_cast %74 : vector<8xf32> to vector<8x1xf32>
    %76 = vector.broadcast %75 : vector<8x1xf32> to vector<8x8xf32>
    %77 = arith.subf %73, %76 : vector<8x8xf32>
    %78 = math.exp %77 : vector<8x8xf32>
    %cst_31 = arith.constant dense<0.000000e+00> : vector<8xf32>
    %79 = vector.multi_reduction <add>, %78, %cst_31 [1] : vector<8x8xf32> to vector<8xf32>
    %80 = vector.shape_cast %79 : vector<8xf32> to vector<8x1xf32>
    %81 = tpu.reciprocal %80 {approx = true} : vector<8x1xf32> -> vector<8x1xf32>
    %82 = vector.broadcast %81 : vector<8x1xf32> to vector<8x8xf32>
    %83 = arith.mulf %78, %82 : vector<8x8xf32>
    %84 = arith.truncf %83 : vector<8x8xf32> to vector<8x8xbf16>
    %85 = vector.extract_strided_slice %42 {offsets = [0, 16], sizes = [8, 16], strides = [1, 1]} : vector<8x32xbf16> to vector<8x16xbf16>
    %cst_32 = arith.constant dense<0.000000e+00> : vector<8x16xf32>
    %86 = tpu.matmul %84, %85, %cst_32 {dimension_numbers = #tpu.dot_dimension_numbers<[1], [0], [0], [1], [0, 0, 1, 1], [], []>} : vector<8x8xbf16>, vector<8x16xbf16>, vector<8x16xf32> -> vector<8x16xf32>
    %c0_33 = arith.constant 0 : index
    %c16 = arith.constant 16 : index
    %87 = vector.load %arg23[%c0_33, %c16] : memref<8x32xf32, #tpu.memory_space<vmem>>, vector<8x16xf32>
    tpu.vector_store %arg23[%c0_33, %c16], %86 {strides = array<i32>} : memref<8x32xf32, #tpu.memory_space<vmem>>, vector<8x16xf32>,
    %c0_34 = arith.constant 0 : index
    %c0_35 = arith.constant 0 : index
    %88 = vector.load %arg23[%c0_34, %c0_35] : memref<8x32xf32, #tpu.memory_space<vmem>>, vector<8x32xf32>
    %89 = arith.truncf %88 : vector<8x32xf32> to vector<8x32xbf16>
    %c0_36 = arith.constant 0 : index
    %c0_37 = arith.constant 0 : index
    %c0_38 = arith.constant 0 : index
    %90 = vector.load %arg12[%c0_36, %c0_37, %c0_38] : memref<1x32x32xbf16, #tpu.memory_space<vmem>>, vector<1x32x32xbf16>
    %91 = vector.shape_cast %90 : vector<1x32x32xbf16> to vector<32x32xbf16>
    %cst_39 = arith.constant dense<0.000000e+00> : vector<8x32xf32>
    %92 = tpu.matmul %89, %91, %cst_39 {dimension_numbers = #tpu.dot_dimension_numbers<[1], [0], [0], [1], [0, 0, 1, 1], [], []>} : vector<8x32xbf16>, vector<32x32xbf16>, vector<8x32xf32> -> vector<8x32xf32>
    %c0_40 = arith.constant 0 : index
    %c0_41 = arith.constant 0 : index
    %c0_42 = arith.constant 0 : index
    %93 = vector.load %arg13[%c0_40, %c0_41, %c0_42] : memref<1x1x32xf32, #tpu.memory_space<vmem>>, vector<1x1x32xf32>
    %94 = vector.shape_cast %93 : vector<1x1x32xf32> to vector<1x32xf32>
    %95 = vector.broadcast %94 : vector<1x32xf32> to vector<8x32xf32>
    %96 = arith.addf %92, %95 : vector<8x32xf32>
    %97 = arith.addf %4, %96 : vector<8x32xf32>
    %c0_43 = arith.constant 0 : index
    %c0_44 = arith.constant 0 : index
    %c0_45 = arith.constant 0 : index
    %98 = vector.load %arg14[%c0_43, %c0_44, %c0_45] : memref<1x1x32xf32, #tpu.memory_space<vmem>>, vector<1x1x32xf32>
    %99 = vector.shape_cast %98 : vector<1x1x32xf32> to vector<1x32xf32>
    %c0_46 = arith.constant 0 : index
    %c0_47 = arith.constant 0 : index
    %c0_48 = arith.constant 0 : index
    %100 = vector.load %arg15[%c0_46, %c0_47, %c0_48] : memref<1x1x32xf32, #tpu.memory_space<vmem>>, vector<1x1x32xf32>
    %101 = vector.shape_cast %100 : vector<1x1x32xf32> to vector<1x32xf32>
    %cst_49 = arith.constant dense<0.000000e+00> : vector<8xf32>
    %102 = vector.multi_reduction <add>, %97, %cst_49 [1] : vector<8x32xf32> to vector<8xf32>
    %103 = vector.shape_cast %102 : vector<8xf32> to vector<8x1xf32>
    %cst_50 = arith.constant 3.200000e+01 : f32
    %104 = vector.broadcast %cst_50 : f32 to vector<8x1xf32>
    %105 = arith.divf %103, %104 : vector<8x1xf32>
    %106 = vector.broadcast %105 : vector<8x1xf32> to vector<8x32xf32>
    %107 = arith.subf %97, %106 : vector<8x32xf32>
    %108 = arith.mulf %107, %107 : vector<8x32xf32>
    %cst_51 = arith.constant dense<0.000000e+00> : vector<8xf32>
    %109 = vector.multi_reduction <add>, %108, %cst_51 [1] : vector<8x32xf32> to vector<8xf32>
    %110 = vector.shape_cast %109 : vector<8xf32> to vector<8x1xf32>
    %cst_52 = arith.constant 3.200000e+01 : f32
    %111 = vector.broadcast %cst_52 : f32 to vector<8x1xf32>
    %112 = arith.divf %110, %111 : vector<8x1xf32>
    %cst_53 = arith.constant 9.99999974E-6 : f32
    %113 = vector.broadcast %cst_53 : f32 to vector<8x1xf32>
    %114 = arith.addf %112, %113 : vector<8x1xf32>
    %115 = math.rsqrt %114 : vector<8x1xf32>
    %116 = vector.broadcast %115 : vector<8x1xf32> to vector<8x32xf32>
    %117 = arith.mulf %107, %116 : vector<8x32xf32>
    %118 = vector.broadcast %99 : vector<1x32xf32> to vector<8x32xf32>
    %119 = arith.mulf %117, %118 : vector<8x32xf32>
    %120 = vector.broadcast %101 : vector<1x32xf32> to vector<8x32xf32>
    %121 = arith.addf %119, %120 : vector<8x32xf32>
    %122 = arith.truncf %121 : vector<8x32xf32> to vector<8x32xbf16>
    %c0_54 = arith.constant 0 : index
    %c0_55 = arith.constant 0 : index
    %c0_56 = arith.constant 0 : index
    %123 = vector.load %arg16[%c0_54, %c0_55, %c0_56] : memref<1x32x128xbf16, #tpu.memory_space<vmem>>, vector<1x32x128xbf16>
    %124 = vector.shape_cast %123 : vector<1x32x128xbf16> to vector<32x128xbf16>
    %cst_57 = arith.constant dense<0.000000e+00> : vector<8x128xf32>
    %125 = tpu.matmul %122, %124, %cst_57 {dimension_numbers = #tpu.dot_dimension_numbers<[1], [0], [0], [1], [0, 0, 1, 1], [], []>} : vector<8x32xbf16>, vector<32x128xbf16>, vector<8x128xf32> -> vector<8x128xf32>
    %c0_58 = arith.constant 0 : index
    %c0_59 = arith.constant 0 : index
    %c0_60 = arith.constant 0 : index
    %126 = vector.load %arg17[%c0_58, %c0_59, %c0_60] : memref<1x1x128xf32, #tpu.memory_space<vmem>>, vector<1x1x128xf32>
    %127 = vector.shape_cast %126 : vector<1x1x128xf32> to vector<1x128xf32>
    %128 = vector.broadcast %127 : vector<1x128xf32> to vector<8x128xf32>
    %129 = arith.addf %125, %128 : vector<8x128xf32>
    %cst_61 = arith.constant 5.000000e-01 : f32
    %130 = vector.broadcast %cst_61 : f32 to vector<8x128xf32>
    %131 = arith.mulf %130, %129 : vector<8x128xf32>
    %132 = arith.mulf %129, %129 : vector<8x128xf32>
    %133 = arith.mulf %132, %129 : vector<8x128xf32>
    %cst_62 = arith.constant 4.471500e-02 : f32
    %134 = vector.broadcast %cst_62 : f32 to vector<8x128xf32>
    %135 = arith.mulf %134, %133 : vector<8x128xf32>
    %136 = arith.addf %129, %135 : vector<8x128xf32>
    %cst_63 = arith.constant 0.797884583 : f32
    %137 = vector.broadcast %cst_63 : f32 to vector<8x128xf32>
    %138 = arith.mulf %137, %136 : vector<8x128xf32>
    %139 = math.tanh %138 : vector<8x128xf32>
    %cst_64 = arith.constant 1.000000e+00 : f32
    %140 = vector.broadcast %cst_64 : f32 to vector<8x128xf32>
    %141 = arith.addf %140, %139 : vector<8x128xf32>
    %142 = arith.mulf %131, %141 : vector<8x128xf32>
    %143 = arith.truncf %142 : vector<8x128xf32> to vector<8x128xbf16>
    %c0_65 = arith.constant 0 : index
    %c0_66 = arith.constant 0 : index
    %c0_67 = arith.constant 0 : index
    %144 = vector.load %arg18[%c0_65, %c0_66, %c0_67] : memref<1x128x32xbf16, #tpu.memory_space<vmem>>, vector<1x128x32xbf16>
    %145 = vector.shape_cast %144 : vector<1x128x32xbf16> to vector<128x32xbf16>
    %cst_68 = arith.constant dense<0.000000e+00> : vector<8x32xf32>
    %146 = tpu.matmul %143, %145, %cst_68 {dimension_numbers = #tpu.dot_dimension_numbers<[1], [0], [0], [1], [0, 0, 1, 1], [], []>} : vector<8x128xbf16>, vector<128x32xbf16>, vector<8x32xf32> -> vector<8x32xf32>
    %c0_69 = arith.constant 0 : index
    %c0_70 = arith.constant 0 : index
    %c0_71 = arith.constant 0 : index
    %147 = vector.load %arg19[%c0_69, %c0_70, %c0_71] : memref<1x1x32xf32, #tpu.memory_space<vmem>>, vector<1x1x32xf32>
    %148 = vector.shape_cast %147 : vector<1x1x32xf32> to vector<1x32xf32>
    %149 = vector.broadcast %148 : vector<1x32xf32> to vector<8x32xf32>
    %150 = arith.addf %146, %149 : vector<8x32xf32>
    %151 = arith.addf %97, %150 : vector<8x32xf32>
    %c1_i32 = arith.constant 1 : i32
    %152 = arith.cmpi eq, %arg1, %c1_i32 : i32
    %153 = arith.extui %152 : i1 to i32
    %c0_i32_72 = arith.constant 0 : i32
    %154 = arith.cmpi ne, %153, %c0_i32_72 : i32
    scf.if %154 {
      %c0_75 = arith.constant 0 : index
      %c0_76 = arith.constant 0 : index
      %158 = vector.load %arg20[%c0_75, %c0_76] : memref<1x32xf32, #tpu.memory_space<vmem>>, vector<1x32xf32>
      %c0_77 = arith.constant 0 : index
      %c0_78 = arith.constant 0 : index
      %159 = vector.load %arg21[%c0_77, %c0_78] : memref<1x32xf32, #tpu.memory_space<vmem>>, vector<1x32xf32>
      %cst_79 = arith.constant dense<0.000000e+00> : vector<8xf32>
      %160 = vector.multi_reduction <add>, %151, %cst_79 [1] : vector<8x32xf32> to vector<8xf32>
      %161 = vector.shape_cast %160 : vector<8xf32> to vector<8x1xf32>
      %cst_80 = arith.constant 3.200000e+01 : f32
      %162 = vector.broadcast %cst_80 : f32 to vector<8x1xf32>
      %163 = arith.divf %161, %162 : vector<8x1xf32>
      %164 = vector.broadcast %163 : vector<8x1xf32> to vector<8x32xf32>
      %165 = arith.subf %151, %164 : vector<8x32xf32>
      %166 = arith.mulf %165, %165 : vector<8x32xf32>
      %cst_81 = arith.constant dense<0.000000e+00> : vector<8xf32>
      %167 = vector.multi_reduction <add>, %166, %cst_81 [1] : vector<8x32xf32> to vector<8xf32>
      %168 = vector.shape_cast %167 : vector<8xf32> to vector<8x1xf32>
      %cst_82 = arith.constant 3.200000e+01 : f32
      %169 = vector.broadcast %cst_82 : f32 to vector<8x1xf32>
      %170 = arith.divf %168, %169 : vector<8x1xf32>
      %cst_83 = arith.constant 9.99999974E-6 : f32
      %171 = vector.broadcast %cst_83 : f32 to vector<8x1xf32>
      %172 = arith.addf %170, %171 : vector<8x1xf32>
      %173 = math.rsqrt %172 : vector<8x1xf32>
      %174 = vector.broadcast %173 : vector<8x1xf32> to vector<8x32xf32>
      %175 = arith.mulf %165, %174 : vector<8x32xf32>
      %176 = vector.broadcast %158 : vector<1x32xf32> to vector<8x32xf32>
      %177 = arith.mulf %175, %176 : vector<8x32xf32>
      %178 = vector.broadcast %159 : vector<1x32xf32> to vector<8x32xf32>
      %179 = arith.addf %177, %178 : vector<8x32xf32>
      %c0_84 = arith.constant 0 : index
      %c0_85 = arith.constant 0 : index
      %c0_86 = arith.constant 0 : index
      %180 = vector.load %arg22[%c0_84, %c0_85, %c0_86] : memref<1x8x32xf32, #tpu.memory_space<vmem>>, vector<1x8x32xf32>
      %181 = vector.shape_cast %180 : vector<1x8x32xf32> to vector<8x32xf32>
      %182 = vector.shape_cast %179 : vector<8x32xf32> to vector<1x8x32xf32>
      tpu.vector_store %arg22[%c0_84, %c0_85, %c0_86], %182 {strides = array<i32>} : memref<1x8x32xf32, #tpu.memory_space<vmem>>, vector<1x8x32xf32>,
    } else {
    }
    %c1_i32_73 = arith.constant 1 : i32
    %155 = arith.cmpi slt, %arg1, %c1_i32_73 : i32
    %156 = arith.extui %155 : i1 to i32
    %c0_i32_74 = arith.constant 0 : i32
    %157 = arith.cmpi ne, %156, %c0_i32_74 : i32
    scf.if %157 {
      %c0_75 = arith.constant 0 : index
      %c0_76 = arith.constant 0 : index
      %c0_77 = arith.constant 0 : index
      %158 = vector.load %arg22[%c0_75, %c0_76, %c0_77] : memref<1x8x32xf32, #tpu.memory_space<vmem>>, vector<1x8x32xf32>
      %159 = vector.shape_cast %158 : vector<1x8x32xf32> to vector<8x32xf32>
      %160 = vector.shape_cast %151 : vector<8x32xf32> to vector<1x8x32xf32>
      tpu.vector_store %arg22[%c0_75, %c0_76, %c0_77], %160 {strides = array<i32>} : memref<1x8x32xf32, #tpu.memory_space<vmem>>, vector<1x8x32xf32>,
    } else {
    }
    return
  }
  func.func @transform_0(%arg0: i32, %arg1: i32) -> (i32, i32, i32) {
    %c0_i32 = arith.constant 0 : i32
    %c0_i32_0 = arith.constant 0 : i32
    %c0_i32_1 = arith.constant 0 : i32
    return %arg0, %c0_i32, %c0_i32_0 : i32, i32, i32
  }
  func.func @transform_1(%arg0: i32, %arg1: i32) -> (i32, i32) {
    %c0_i32 = arith.constant 0 : i32
    %c0_i32_0 = arith.constant 0 : i32
    %c0_i32_1 = arith.constant 0 : i32
    return %c0_i32, %c0_i32_0 : i32, i32
  }
  func.func @transform_2(%arg0: i32, %arg1: i32) -> (i32, i32) {
    %c0_i32 = arith.constant 0 : i32
    %c0_i32_0 = arith.constant 0 : i32
    %c0_i32_1 = arith.constant 0 : i32
    return %c0_i32, %c0_i32_0 : i32, i32
  }
  func.func @transform_3(%arg0: i32, %arg1: i32) -> (i32, i32) {
    %c0_i32 = arith.constant 0 : i32
    %c0_i32_0 = arith.constant 0 : i32
    %c0_i32_1 = arith.constant 0 : i32
    return %c0_i32, %c0_i32_0 : i32, i32
  }
  func.func @transform_4(%arg0: i32, %arg1: i32) -> (i32, i32) {
    %c0_i32 = arith.constant 0 : i32
    %c0_i32_0 = arith.constant 0 : i32
    %c0_i32_1 = arith.constant 0 : i32
    return %c0_i32, %c0_i32_0 : i32, i32
  }
  func.func @transform_5(%arg0: i32, %arg1: i32) -> (i32, i32) {
    %c0_i32 = arith.constant 0 : i32
    %c0_i32_0 = arith.constant 0 : i32
    %c0_i32_1 = arith.constant 0 : i32
    return %c0_i32, %c0_i32_0 : i32, i32
  }
  func.func @transform_6(%arg0: i32, %arg1: i32) -> (i32, i32, i32) {
    %c0_i32 = arith.constant 0 : i32
    %c0_i32_0 = arith.constant 0 : i32
    %c0_i32_1 = arith.constant 0 : i32
    return %arg1, %c0_i32, %c0_i32_0 : i32, i32, i32
  }
  func.func @transform_7(%arg0: i32, %arg1: i32) -> (i32, i32, i32) {
    %c0_i32 = arith.constant 0 : i32
    %c0_i32_0 = arith.constant 0 : i32
    %c0_i32_1 = arith.constant 0 : i32
    return %arg1, %c0_i32, %c0_i32_0 : i32, i32, i32
  }
  func.func @transform_8(%arg0: i32, %arg1: i32) -> (i32, i32, i32) {
    %c0_i32 = arith.constant 0 : i32
    %c0_i32_0 = arith.constant 0 : i32
    %c0_i32_1 = arith.constant 0 : i32
    return %arg1, %c0_i32, %c0_i32_0 : i32, i32, i32
  }
  func.func @transform_9(%arg0: i32, %arg1: i32) -> (i32, i32, i32) {
    %c0_i32 = arith.constant 0 : i32
    %c0_i32_0 = arith.constant 0 : i32
    %c0_i32_1 = arith.constant 0 : i32
    return %arg1, %c0_i32, %c0_i32_0 : i32, i32, i32
  }
  func.func @transform_10(%arg0: i32, %arg1: i32) -> (i32, i32, i32) {
    %c0_i32 = arith.constant 0 : i32
    %c0_i32_0 = arith.constant 0 : i32
    %c0_i32_1 = arith.constant 0 : i32
    return %arg1, %c0_i32, %c0_i32_0 : i32, i32, i32
  }
  func.func @transform_11(%arg0: i32, %arg1: i32) -> (i32, i32, i32) {
    %c0_i32 = arith.constant 0 : i32
    %c0_i32_0 = arith.constant 0 : i32
    %c0_i32_1 = arith.constant 0 : i32
    return %arg1, %c0_i32, %c0_i32_0 : i32, i32, i32
  }
  func.func @transform_12(%arg0: i32, %arg1: i32) -> (i32, i32, i32) {
    %c0_i32 = arith.constant 0 : i32
    %c0_i32_0 = arith.constant 0 : i32
    %c0_i32_1 = arith.constant 0 : i32
    return %arg1, %c0_i32, %c0_i32_0 : i32, i32, i32
  }
  func.func @transform_13(%arg0: i32, %arg1: i32) -> (i32, i32, i32) {
    %c0_i32 = arith.constant 0 : i32
    %c0_i32_0 = arith.constant 0 : i32
    %c0_i32_1 = arith.constant 0 : i32
    return %arg1, %c0_i32, %c0_i32_0 : i32, i32, i32
  }
  func.func @transform_14(%arg0: i32, %arg1: i32) -> (i32, i32, i32) {
    %c0_i32 = arith.constant 0 : i32
    %c0_i32_0 = arith.constant 0 : i32
    %c0_i32_1 = arith.constant 0 : i32
    return %arg1, %c0_i32, %c0_i32_0 : i32, i32, i32
  }
  func.func @transform_15(%arg0: i32, %arg1: i32) -> (i32, i32, i32) {
    %c0_i32 = arith.constant 0 : i32
    %c0_i32_0 = arith.constant 0 : i32
    %c0_i32_1 = arith.constant 0 : i32
    return %arg1, %c0_i32, %c0_i32_0 : i32, i32, i32
  }
  func.func @transform_16(%arg0: i32, %arg1: i32) -> (i32, i32, i32) {
    %c0_i32 = arith.constant 0 : i32
    %c0_i32_0 = arith.constant 0 : i32
    %c0_i32_1 = arith.constant 0 : i32
    return %arg1, %c0_i32, %c0_i32_0 : i32, i32, i32
  }
  func.func @transform_17(%arg0: i32, %arg1: i32) -> (i32, i32, i32) {
    %c0_i32 = arith.constant 0 : i32
    %c0_i32_0 = arith.constant 0 : i32
    %c0_i32_1 = arith.constant 0 : i32
    return %arg1, %c0_i32, %c0_i32_0 : i32, i32, i32
  }
  func.func @transform_18(%arg0: i32, %arg1: i32) -> (i32, i32) {
    %c0_i32 = arith.constant 0 : i32
    %c0_i32_0 = arith.constant 0 : i32
    %c0_i32_1 = arith.constant 0 : i32
    return %c0_i32, %c0_i32_0 : i32, i32
  }
  func.func @transform_19(%arg0: i32, %arg1: i32) -> (i32, i32) {
    %c0_i32 = arith.constant 0 : i32
    %c0_i32_0 = arith.constant 0 : i32
    %c0_i32_1 = arith.constant 0 : i32
    return %c0_i32, %c0_i32_0 : i32, i32
  }
  func.func @transform_20(%arg0: i32, %arg1: i32) -> (i32, i32, i32) {
    %c0_i32 = arith.constant 0 : i32
    %c0_i32_0 = arith.constant 0 : i32
    %c0_i32_1 = arith.constant 0 : i32
    return %arg0, %c0_i32, %c0_i32_0 : i32, i32, i32
  }
}

</mosaic_0001>

<bundles_post_ra>
// kernel: tpu_custom_call.1
= control target key start
LH: loop header
LB: loop body
LE: loop exit
PB: predicated region body
PF: predicated region fallthrough
CT: control target
= control target key end

     0   :  { %s2316_s0 = inlined_call_operand.vmem [shape: f32[2,8,12], index: 0, kind: input, shape index: {}]   ;;  %s2317_s1 = inlined_call_operand.vmem [shape: bf16[12,24], index: 1, kind: input, shape index: {}]   ;;  %s2318_s2 = inlined_call_operand.vmem [shape: f32[1,24], index: 2, kind: input, shape index: {}]   ;;  %s2319_s3 = inlined_call_operand.vmem [shape: bf16[24,32], index: 3, kind: input, shape index: {}]   ;;  %s2320_s4 = inlined_call_operand.vmem [shape: f32[1,32], index: 4, kind: input, shape index: {}]   ;;  %s2321_s5 = inlined_call_operand.vmem [shape: f32[8,32], index: 5, kind: input, shape index: {}]   ;;  %s2322_s6 = inlined_call_operand.vmem [shape: f32[2,1,32], index: 6, kind: input, shape index: {}]   ;;  %s2323_s7 = inlined_call_operand.vmem [shape: f32[2,1,32], index: 7, kind: input, shape index: {}]   ;;  %s2324_s8 = inlined_call_operand.vmem [shape: bf16[2,32,96], index: 8, kind: input, shape index: {}]   ;;  %s2325_s9 = inlined_call_operand.vmem [shape: f32[2,1,96], index: 9, kind: input, shape index: {}]   ;;  %s2326_s10 = inlined_call_operand.vmem [shape: bf16[2,32,32], index: 10, kind: input, shape index: {}]   ;;  %s2327_s11 = inlined_call_operand.vmem [shape: f32[2,1,32], index: 11, kind: input, shape index: {}]   ;;  %s2328_s12 = inlined_call_operand.vmem [shape: f32[2,1,32], index: 12, kind: input, shape index: {}]   ;;  %s2329_s13 = inlined_call_operand.vmem [shape: f32[2,1,32], index: 13, kind: input, shape index: {}]   ;;  %s2330_s14 = inlined_call_operand.vmem [shape: bf16[2,32,128], index: 14, kind: input, shape index: {}]   ;;  %s2331_s15 = inlined_call_operand.vmem [shape: f32[2,1,128], index: 15, kind: input, shape index: {}]   ;;  %s2332_s16 = inlined_call_operand.vmem [shape: bf16[2,128,32], index: 16, kind: input, shape index: {}]   ;;  %s2333_s17 = inlined_call_operand.vmem [shape: f32[2,1,32], index: 17, kind: input, shape index: {}]   ;;  %s2334_s18 = inlined_call_operand.vmem [shape: f32[1,32], index: 18, kind: input, shape index: {}]   ;;  %s2335_s19 = inlined_call_operand.vmem [shape: f32[1,32], index: 19, kind: input, shape index: {}]   ;;  %s2336_s20 = inlined_call_operand.hbm [shape: f32[2,8,32], index: 20, kind: output, shape index: {}]  }
   0x1   :  { %2354 = sst [smem:[#allocation19_spill]] %s2316_s0 }
   0x2   :  { %2355 = sst [smem:[#allocation20_spill]] %s2317_s1 }
   0x3   :  { %2356 = sst [smem:[#allocation21_spill]] %s2318_s2 }
   0x4   :  { %2357 = sst [smem:[#allocation22_spill]] %s2319_s3 }
   0x5   :  { %2358 = sst [smem:[#allocation23_spill]] %s2320_s4 }
   0x6   :  { %2359 = sst [smem:[#allocation24_spill]] %s2321_s5 }
   0x7   :  { %2360 = sst [smem:[#allocation25_spill]] %s2324_s8 }
   0x8   :  { %2361 = sst [smem:[#allocation26_spill]] %s2326_s10 }
   0x9   :  { %2362 = sst [smem:[#allocation27_spill]] %s2328_s12 }
   0xa   :  { %2363 = sst [smem:[#allocation28_spill]] %s2332_s16 }
   0xb   :  { %2364 = sst [smem:[#allocation29_spill]] %s2334_s18 }
   0xc   :  { %2365 = sst [smem:[#allocation30_spill]] %s2335_s19 }
   0xd   :  { %2366 = sst [smem:[#allocation31_spill]] %s2336_s20 }
   0xe   :  { %25 = vsyncpa [#allocation4], 0 }
   0xf   :  { %27 = vsyncpa [#allocation4 + $0x1], 0  ;;  %s2002_s1 = smov 0   ;;  %s2004_s22 = smov 0  }
  0x10   :  { %s2006_s23 = smov 0   ;;  %s2008_s24 = smov 0  }
  0x11   :  { %s2010_s2 = smov 0   ;;  %s2012_s25 = smov 0  }
  0x12   :  { %s2014_s3 = smov 0   ;;  %s2016_s26 = smov 0  }
  0x13   :  { %2367 = sst [smem:[#allocation6_spill]] %s2016_s26 }
  0x14 LB: > { %s2369_s26 = sld [smem:[#allocation6_spill]]  ;;  %s42_s4 = sadd.s32 1, %s1880_s25  ;;  %s1884_s3 = sphi %s2014_s3, %s2423_s3   ;;  %s1880_s25 = sphi %s2012_s25, %s2422_s25   ;;  %s1876_s2 = sphi %s2010_s2, %s2421_s2   ;;  %s1872_s24 = sphi %s2008_s24, %s2420_s24   ;;  %s1868_s23 = sphi %s2006_s23, %s2419_s23   ;;  %s1864_s22 = sphi %s2004_s22, %s2418_s22   ;;  %s1860_s1 = sphi %s2002_s1, %s2417_s1  }
  0x15   : > { %2370 = sst [smem:[#allocation6_spill]] %s1860_s1  ;;  %p43_p0 = scmp.ge.s32.totalorder %s42_s4, 2 }
  0x16   : > { %2371 = sst [smem:[#allocation7_spill]] %s1864_s22  ;;  %s45_s29 = sadd.s32 1, %s1884_s3 }
  0x17   : > { %2372 = sst [smem:[#allocation8_spill]] %s1868_s23  ;;  %p547_p1 = scmp.ne.s32.totalorder %s1868_s23, %s1864_s22 }
  0x18   : > { %2373 = sst [smem:[#allocation9_spill]] %s1872_s24  ;;  %s2426_s4 = smov (%p43_p0, %s42_s4), 0 }
  0x19   : > { %2374 = sst [smem:[#allocation10_spill]] %s1876_s2  ;;  %s2428_s29 = smov (!%p43_p0, %s45_s29), %s1884_s3 }
  0x1a   : > { %2375 = sst [smem:[#allocation11_spill]] %s1880_s25  ;;  %s1571_s27 = sadd.s32 4294967295, %s2369_s26  }
  0x1b   : > { %2376 = sst [smem:[#allocation12_spill]] %s1884_s3  ;;  %s1572_s28 = sadd.s32 4294967294, %s2369_s26  }
  0x1c   : > { %2377 = sst [smem:[#allocation13_spill]] %s2369_s26  ;;  %p548_p2 = scmp.eq.s32.totalorder %s1571_s27, 3 }
  0x1d   : > { %2378 = sst [smem:[#allocation14_spill]] %s2426_s4  ;;  %p553_p4 = scmp.ne.s32.totalorder %s1864_s22, %s1860_s1 }
  0x1e   : > { %p2051_p3 = por %p548_p2, %p547_p1  ;;  %p47_p5 = scmp.ge.s32.totalorder %s2428_s29, 2 }
  0x1f   : > { %p554_p6 = scmp.eq.s32.totalorder %s1572_s28, 3  ;;  %p1575_p7 = scmp.ge.s32.totalorder %s2369_s26, 1 }
  0x20   : > { %s2379_s30 = scalar_select %p2051_p3, 1, 0 }
  0x21   : > { %p680_p8 = scmp.lt.s32.totalorder %s2369_s26, 5  ;;  %s2430_s29 = smov (%p47_p5, %s2428_s29), 0 }
  0x22   : > { %2380 = sst [smem:[#allocation15_spill]] %s2379_s30  ;;  %p2061_p9 = por %p554_p6, %p553_p4 }
  0x23   : > { %2381 = sst [smem:[#allocation16_spill]] %s2430_s29  ;;  %p681_p10 = pnand %p1575_p7, %p680_p8 }
  0x24   : > { %s2382_s0 = scalar_select %p2061_p9, 1, 0 }
  0x25   : > { %s534_s21 = ssub.s32 %s1884_s3, %s2430_s29  ;;  %s537_s27 = sadd.s32 1, %s1868_s23 }
  0x26   : > { %2383 = sst [smem:[#allocation17_spill]] %s2382_s0  ;;  %p535_p11 = scmp.eq.s32.totalorder %s534_s21, 0 }
  0x27   : > { %684 = sbr.rel (%p681_p10) target bundleno = 2906 (0xb5a), region = 100  ;;  %s2344_s28 = sand.u32 (!%p681_p10), 1, %s1864_s22  }
  0x28   : > { %s2069_s4 = scalar_select %p535_p11, %s1868_s23, %s537_s27  }
  0x29   : > { %p781_p12 = scmp.lt.s32.totalorder (!%p681_p10), %s1876_s2, 1  ;;  %s1576_s25 = sshll.u32 (!%p681_p10), %s2344_s28, 3 }
  0x2a   : > { %2384 = sst [smem:[#allocation18_spill]] %s2069_s4  ;;  %p785_p13 = scmp.lt.s32.totalorder (!%p681_p10), %s1872_s24, 1 }
  0x2b   : > { %s2385_s3 = sld [smem:[#allocation19_spill]] (!%p681_p10)  ;;  %s2137_s18 = scalar_lea.vmem (!%p681_p10), [#allocation3], %s1576_s25 }
  0x2c   : > { %s782_s1 = scalar_select %p781_p12, %s1876_s2, 1 }
  0x2d   : > { %s2078_s0 = scalar_select %p785_p13, %s1872_s24, 1 }
  0x2e   : > { %s1577_s21 = sshll.u32 %s782_s1, 3  ;;  %s2386_s8 = sld [smem:[#allocation25_spill]] }
  0x2f   : > { %s1666_s2 = sshll.u32 %s2078_s0, 4  ;;  %s2387_s10 = sld [smem:[#allocation26_spill]] }
  0x30   : > { %s2121_s1 = scalar_lea.vmem %s2330_s14, %s1666_s2  ;;  %s820_s16 = scalar_lea.vmem %s2331_s15, %s2078_s0 }
  0x31   : > { %s784_s4 = scalar_lea.vmem %s2385_s3, %s1577_s21  ;;  %s828_s20 = scalar_lea.vmem %s2333_s17, %s2078_s0 }
  0x32   : > { %s2389_s22 = sld [smem:[#allocation28_spill]] }
  0x33   : > { %s2390_s19 = sld [smem:[#allocation9_spill]] }
  0x34   : > { %s2095_s5 = scalar_lea.vmem %s2386_s8, %s1666_s2 }
  0x35   : > { %s2104_s21 = scalar_lea.vmem %s2387_s10, %s1666_s2  ;;  %s1669_s10 = sshll.u32 %s2078_s0, 6 }
  0x38   : > { %s2135_s12 = scalar_lea.vmem %s2389_s22, %s1669_s10 }
  0x39   : > { %p1586_p0 = scmp.ne.s32.totalorder %s2390_s19, 0 }
  0x3a   : > { %s2391_s24 = sld [smem:[#allocation20_spill]] (!%p1586_p0) }
  0x3b   : > { %833 = sbr.rel (%p1586_p0) target bundleno = 338 (0x152), region = 104  ;;  %s2393_s25 = sld [smem:[#allocation22_spill]] (!%p1586_p0) }
  0x3c   : > { %s2395_s19 = sld [smem:[#allocation21_spill]] (!%p1586_p0) }
  0x3d   : > { %s2397_s10 = sld [smem:[#allocation24_spill]] (!%p1586_p0) }
  0x40   : > { %s2392_s26 = smov %s2391_s24  ;;  %v1589_v0 = vld [vmem:[%s2391_s24] sm:$0xf]  ;;  %vm851_vm0 = vcmask 1045504   ;;  %vm847_vm1 = vcmask 97280   ;;  %vm890_vm2 = vcmask 1043456   ;;  %vm886_vm3 = vcmask 195584  }
  0x41   : > { %v1670_v1 = vld [vmem:[%s2392_s26] sm:$0x30]  ;;  %s2394_s28 = smov %s2393_s25  ;;  %v871_v6 = vld [vmem:[%s2393_s25 + $0x8] sm:$0xf]  ;;  %s2396_s24 = sld [smem:[#allocation23_spill]]  ;;  %vm909_vm4 = vcmask 261120  }
  0x42   : > { %v834_v2 = vld [vmem:[%s784_s4] sm:$0xff]  ;;  %v1590_v3 = vor.u32 %v1670_v1, %v1589_v0  ;;  %v882_v7 = vunpack.c.l.b16 %v871_v6 }
  0x43   : > { %v838_v5 = vpack.c.bf16 %v834_v2, %v834_v2  ;;  %v1671_v10 = vld [vmem:[%s2394_s28] sm:$0xff] }
  0x44   : > { %v853_v4 = vsel %vm851_vm0, %v1590_v3, 0  ;;  %v884_v8 = vpack.c.b16 %v882_v7, %v882_v7  ;;  %v1764_v11 = vld [vmem:[%s2395_s19] ss:$0 sm:$0xff] }
  0x45   : > { %862 = vmatpush.bf16.msra.mxu0 %v853_v4  ;;  %v907_v19 = vld [vmem:[%s2397_s10] sm:$0xff] }
  0x46   : > { %v892_v9 = vsel %vm890_vm2, %v884_v8, 0 }
  0x47   : > { %900 = vmatpush.bf16.msra.mxu1 %v892_v9  ;;  %v1765_v17 = vld [vmem:[%s2396_s24] ss:$0 sm:$0xff] }
  0x48   : > { %1591 = vmatmul.msk.bf16.vlgmr.msra.gmra.mxu0 %vm847_vm1, %v838_v5 }
  0x4b   : > { %901 = vmatpush.bf16.msra.mxu1 %v1671_v10 }
  0xc5   : > { %v864_v12 = vpop.f32.mrf.mxu0 }
  0xc6   : > { %v865_v13 = vadd.f32 %v1764_v11, %v864_v12 }
  0xc8   : > { %v868_v14 = vmax.f32 %v865_v13, 0.0 }
  0xca   : > { %v873_v15 = vpack.c.bf16 %v868_v14, %v868_v14 }
  0xcc   : > { %1596 = vmatmul.msk.bf16.vlgmr.msra.gmra.mxu1 %vm886_vm3, %v873_v15 }
  0xcd   : > { %v866_v16 = vpop.f32.mrf.mxu0 }
 0x149   : > { %v903_v18 = vpop.f32.mrf.mxu1 }
 0x14a   : > { %v904_v20 = vadd.f32 %v1765_v17, %v903_v18 }
 0x14c   : > { %v908_v21 = vadd.f32 %v907_v19, %v904_v20 }
 0x14e   : > { %910 = vst.msk [vmem:[%s2137_s18] sm:$0xff] %vm909_vm4, %v908_v21 }
 0x151   : > { %v905_v22 = vpop.f32.mrf.mxu1 }
 0x152 PF: > { %vm914_vm5 = vcmask 261120   ;;  %v1890_v25 = vmov 32.0   ;;  %v1673_v37 = vld [vmem:[%s2095_s5 + $0x8] sm:$0xff]  ;;  %v1672_v38 = vld [vmem:[%s2095_s5] sm:$0xff]  ;;  %s2398_s5 = scalar_lea.vmem %s2322_s6, %s2078_s0  ;;  %s2399_s4 = scalar_lea.vmem %s2323_s7, %s2078_s0  ;;  %vm1041_vm10 = vcmask 1043456   ;;  %vm1000_vm11 = vcmask 130048  }
 0x153   : > { %1774 = vrcp.f32 %v1890_v25  ;;  %982 = vmatpush.bf16.msra.mxu0 %v1673_v37  ;;  %v1766_v48 = vld [vmem:[%s2398_s5] ss:$0 sm:$0xff]  ;;  %s2400_s8 = scalar_lea.vmem %s2325_s9, %s2078_s0  ;;  %s1891_s2 = smov 80   ;;  %v991_v6 = vlaneseq  ;;  %vm1021_vm13 = vcmask 64512   ;;  %vm1121_vm14 = vcmask 261248  }
 0x154   : > { %v1767_v51 = vld [vmem:[%s2399_s4] ss:$0 sm:$0xff]  ;;  %s1892_s24 = smov 96   ;;  %s1893_s29 = smov 64  }
 0x155   : > { %v2163_v23 = vld [vmem:[%s2137_s18] sm:$0xff]  ;;  %v1768_v55 = vld [vmem:[%s2400_s8] ss:$0 sm:$0xff]  ;;  %v992_v7 = vshrl.u32 %v991_v6, 7  ;;  %v994_v8 = vand.u32 127, %v991_v6  ;;  %s1894_s3 = smov 48   ;;  %s2401_s23 = scalar_lea.vmem %s2327_s11, %s2078_s0 }
 0x156   : > { %v915_v24 = vsel %vm914_vm5, %v2163_v23, 0.0  ;;  %s1895_s10 = smov 112   ;;  %s1896_s22 = smov 16  }
 0x157   : > { %916 = vadd.xlane.f32.xlu0 %v915_v24  ;;  %983 = vmatpush.bf16.msra.mxu0 %v1672_v38  ;;  %vm995_vm12 = vcmp.le.s32.totalorder %v994_v8, %v992_v7  ;;  %s2402_s30 = sld [smem:[#allocation27_spill]]  ;;  %s2404_s8 = scalar_lea.vmem %s2329_s13, %s2078_s0 }
 0x159   : > { %v1775_v26 = vpop.eup %1774 }
 0x15a   : > { %v919_v27 = vmul.f32 32.0, %v1775_v26  ;;  %vm923_vm6 = vweird.f32 %v1775_v26 }
 0x15c   : > { %v920_v28 = vsub.f32 1.0, %v919_v27 }
 0x15d   : > { %s2403_s4 = scalar_lea.vmem %s2402_s30, %s2078_s0 }
 0x15e   : > { %v921_v29 = vmul.f32 %v1775_v26, %v920_v28  ;;  %v1770_v8 = vld [vmem:[%s2403_s4] ss:$0 sm:$0xff] }
 0x160   : > { %v922_v30 = vadd.f32 %v1775_v26, %v921_v29 }
 0x162   : > { %v2167_v31 = vsel %vm923_vm6, %v1775_v26, %v922_v30 }
 0x1ca   : > { %v917_v32 = vpop.xlane.xlu0 %916 }
 0x1cb   : > { %v925_v33 = vmul.f32 %v2167_v31, %v917_v32 }
 0x1cd   : > { %v926_v34 = vsub.f32 %v2163_v23, %v925_v33 }
 0x1cf   : > { %v927_v35 = vmul.f32 %v926_v34, %v926_v34 }
 0x1d1   : > { %v928_v36 = vsel %vm914_vm5, %v927_v35, 0.0 }
 0x1d2   : > { %929 = vadd.xlane.f32.xlu0 %v928_v36 }
 0x245   : > { %v930_v39 = vpop.xlane.xlu0 %929 }
 0x246   : > { %v931_v40 = vmul.f32 %v930_v39, %v2167_v31 }
 0x248   : > { %v932_v41 = vadd.f32 1e-05, %v931_v40 }
 0x24a   : > { %1776 = vrsqrt.f32 %v932_v41  ;;  %vm939_vm8 = vweird.f32 %v932_v41 }
 0x250   : > { %v1777_v42 = vpop.eup %1776 }
 0x251   : > { %v934_v43 = vmul.f32 %v1777_v42, %v932_v41  ;;  %vm940_vm7 = vweird.f32 %v1777_v42 }
 0x252   : > { %vm941_vm9 = vmor %vm939_vm8, %vm940_vm7 }
 0x253   : > { %v935_v44 = vmul.f32 %v1777_v42, %v934_v43 }
 0x255   : > { %v936_v45 = vmul.f32 0.5, %v935_v44 }
 0x257   : > { %v937_v46 = vsub.f32 1.5, %v936_v45  ;;  %v1674_v45 = vld [vmem:[%s2104_s21] sm:$0xff] }
 0x259   : > { %v938_v47 = vmul.f32 %v1777_v42, %v937_v46 }
 0x25b   : > { %v942_v49 = vsel %vm941_vm9, %v1777_v42, %v938_v47  ;;  %v1675_v42 = vld [vmem:[%s2104_s21 + $0x8] sm:$0xff] }
 0x25c   : > { %v943_v50 = vmul.f32 %v942_v49, %v926_v34  ;;  %1154 = vmatpush.bf16.msrb.mxu0 %v1675_v42  ;;  %v1769_v49 = vld [vmem:[%s2401_s23] ss:$0 sm:$0xff] }
 0x25e   : > { %v947_v52 = vmul.f32 %v1766_v48, %v943_v50 }
 0x260   : > { %v951_v53 = vadd.f32 %v1767_v51, %v947_v52  ;;  %1155 = vmatpush.bf16.msrb.mxu0 %v1674_v45 }
 0x262   : > { %v952_v54 = vpack.c.bf16 %v951_v53, %v951_v53 }
 0x264   : > { %1605 = vmatmul.msk.bf16.vlgmr.msra.gmra.mxu0 %vm914_vm5, %v952_v54 }
 0x2e1   : > { %v985_v56 = vpop.f32.mrf.mxu0 }
 0x2e2   : > { %v986_v57 = vadd.f32 %v1768_v55, %v985_v56 }
 0x2e4   : > { %v990_v58 = vpack.c.bf16 %v986_v57, %v986_v57  ;;  %v989_v4 = vmul.f32 0.25, %v986_v57 }
 0x2e6   : > { %1062 = vrot.lane.b32.xlu0 %v990_v58, %s1891_s2  ;;  %998 = vrot.lane.b32.xlu1 %v990_v58, %s1892_s24  ;;  %v1034_v59 = vunpack.c.l.b16 %v990_v58  ;;  %v996_v5 = vpack.c.bf16 %v989_v4, %v989_v4 }
 0x2e8   : > { %v1035_v60 = vpack.c.b16 %v1034_v59, %v1034_v59 }
 0x2e9   : > { %v987_v61 = vpop.f32.mrf.mxu0 }
 0x2ea   : > { %1036 = vrot.lane.b32.xlu2 %v1035_v60, %s1893_s29  ;;  %v1676_v61 = vld [vmem:[%s2121_s1] sm:$0xff] }
 0x344   : > { %v1037_v62 = vpop.permute.xlu2 %1036 }
 0x345   : > { %v1043_v63 = vsel %vm1041_vm10, %v1037_v62, 0 }
 0x346   : > { %1052 = vmatpush.bf16.msra.mxu2 %v1043_v63 }
 0x358   : > { %v1063_v0 = vpop.permute.xlu0 %1062  ;;  %v999_v1 = vpop.permute.xlu1 %998 }
 0x359   : > { %v1005_v2 = vsel %vm1000_vm11, %v999_v1, 0  ;;  %v1068_v3 = vsel %vm1000_vm11, %v1063_v0, 0  ;;  %v1684_v0 = vld [vmem:[%s2135_s12 + $0x30] sm:$0xff] }
 0x35a   : > { %1014 = vmatpush.bf16.xpose.msra.mxu1 %v1005_v2  ;;  %1077 = vmatpush.bf16.xpose.msrb.mxu2 %v1068_v3 }
 0x361   : > { %1606 = vmatmul.msk.bf16.vlgmr.msra.gmra.mxu1 %vm1000_vm11, %v996_v5 }
 0x3de   : > { %v1016_v9 = vpop.f32.mrf.mxu1 }
 0x3df   : > { %v1020_v10 = vsel %vm995_vm12, %v1016_v9, -3.4028235e+38 }
 0x3e0   : > { %v1022_v11 = vsel %vm1021_vm13, %v1020_v10, -inf }
 0x3e1   : > { %1023 = vmax.xlane.f32.xlu1 %v1022_v11  ;;  %v1771_v11 = vld [vmem:[%s2404_s8] ss:$0 sm:$0xff] }
 0x3e6   : > { %v1018_v12 = vpop.f32.mrf.mxu1 }
 0x3fa   : > { %1096 = vrot.lane.b32.xlu1 %v1035_v60, %s1894_s3  ;;  %v1677_v60 = vld [vmem:[%s2121_s1 + $0x8] sm:$0xff] }
 0x3fb   : > { %1224 = vmatpush.bf16.msrb.mxu1 %v1677_v60 }
 0x3ff   : > { %1225 = vmatpush.bf16.msrb.mxu1 %v1676_v61 }
 0x454   : > { %v1024_v13 = vpop.xlane.xlu1 %1023 }
 0x455   : > { %v1025_v14 = vsub.f32 %v1020_v10, %v1024_v13 }
 0x457   : > { %v1026_v15 = vmul.f32 1.442695, %v1025_v14 }
 0x459   : > { %1778 = vpow2.f32 %v1026_v15  ;;  %v1683_v15 = vld [vmem:[%s2135_s12 + $0x28] sm:$0xff] }
 0x45f   : > { %v1779_v16 = vpop.eup %1778 }
 0x460   : > { %v1028_v17 = vsel %vm1021_vm13, %v1779_v16, 0.0 }
 0x461   : > { %1029 = vadd.xlane.f32.xlu2 %v1028_v17  ;;  %v1681_v17 = vld [vmem:[%s2135_s12 + $0x18] sm:$0xff] }
 0x46c   : > { %v1097_v21 = vpop.permute.xlu1 %1096 }
 0x46d   : > { %v1102_v24 = vsel %vm1041_vm10, %v1097_v21, 0  ;;  %v1772_v21 = vld [vmem:[%s820_s16] ss:$0 sm:$0xff]  ;;  %s2405_s16 = sld [smem:[#allocation9_spill]] }
 0x473   : > { %p1660_p1 = scmp.ne.s32.totalorder %s2405_s16, 1 }
 0x474   : > { %s2406_s3 = sld [smem:[#allocation29_spill]] (!%p1660_p1) }
 0x475   : > { %s2407_s25 = sld [smem:[#allocation30_spill]] (!%p1660_p1) }
 0x479   : > { %1060 = vrot.lane.b32.xlu2 %v996_v5, %s1895_s10 }
 0x4d4   : > { %v1030_v18 = vpop.xlane.xlu2 %1029 }
 0x4d5   : > { %1780 = vrcp.f32 %v1030_v18  ;;  %v1680_v18 = vld [vmem:[%s2135_s12 + $0x10] sm:$0xff] }
 0x4db   : > { %v1781_v19 = vpop.eup %1780 }
 0x4dc   : > { %v1032_v20 = vmul.f32 %v1781_v19, %v1779_v16  ;;  %v1061_v25 = vpop.permute.xlu2 %1060  ;;  %v1682_v16 = vld [vmem:[%s2135_s12 + $0x20] sm:$0xff]  ;;  %v1679_v19 = vld [vmem:[%s2135_s12 + $0x8] sm:$0xff] }
 0x4de   : > { %v1033_v22 = vpack.c.bf16 %v1032_v20, %v1032_v20  ;;  %v1678_v20 = vld [vmem:[%s2135_s12] sm:$0xff] }
 0x4e0   : > { %1607 = vmatmul.msk.bf16.vlgmr.msra.gmra.mxu2 %vm1021_vm13, %v1033_v22 }
 0x4e1   : > { %1111 = vmatpush.bf16.msra.mxu2 %v1102_v24 }
 0x4f0   : > { %1608 = vmatmul.msk.bf16.vlgmr.msrb.gmra.mxu2 %vm1000_vm11, %v1061_v25 }
 0x563   : > { %v1054_v26 = vpop.f32.mrf.mxu2 }
 0x564   : > { %1058 = vst.msk [vmem:[#allocation2] sm:$0xff] %vm1000_vm11, %v1054_v26 }
 0x56b   : > { %v1056_v27 = vpop.f32.mrf.mxu2 }
 0x573   : > { %v1079_v28 = vpop.f32.mrf.mxu2 }
 0x574   : > { %v1083_v29 = vsel %vm995_vm12, %v1079_v28, -3.4028235e+38 }
 0x575   : > { %v1084_v30 = vsel %vm1021_vm13, %v1083_v29, -inf }
 0x576   : > { %1085 = vmax.xlane.f32.xlu0 %v1084_v30 }
 0x57b   : > { %v1081_v32 = vpop.f32.mrf.mxu2 }
 0x5e9   : > { %v1086_v33 = vpop.xlane.xlu0 %1085 }
 0x5ea   : > { %v1087_v34 = vsub.f32 %v1083_v29, %v1086_v33 }
 0x5ec   : > { %v1088_v35 = vmul.f32 1.442695, %v1087_v34 }
 0x5ee   : > { %1782 = vpow2.f32 %v1088_v35 }
 0x5f4   : > { %v1783_v36 = vpop.eup %1782 }
 0x5f5   : > { %v1090_v37 = vsel %vm1021_vm13, %v1783_v36, 0.0 }
 0x5f6   : > { %1091 = vadd.xlane.f32.xlu2 %v1090_v37  ;;  %v1773_v37 = vld [vmem:[%s828_s20] ss:$0 sm:$0xff] }
 0x669   : > { %v1092_v38 = vpop.xlane.xlu2 %1091 }
 0x66a   : > { %1784 = vrcp.f32 %v1092_v38 }
 0x670   : > { %v1785_v39 = vpop.eup %1784 }
 0x671   : > { %v1094_v40 = vmul.f32 %v1785_v39, %v1783_v36 }
 0x673   : > { %v1095_v41 = vpack.c.bf16 %v1094_v40, %v1094_v40 }
 0x675   : > { %1609 = vmatmul.msk.bf16.vlgmr.msra.gmra.mxu2 %vm1021_vm13, %v1095_v41 }
 0x6f8   : > { %v1113_v43 = vpop.f32.mrf.mxu2 }
 0x6f9   : > { %1118 = vrot.lane.b32.xlu1 %v1113_v43, %s1896_s22 }
 0x700   : > { %v1115_v44 = vpop.f32.mrf.mxu2 }
 0x76b   : > { %v1119_v46 = vpop.permute.xlu1 %1118 }
 0x76c   : > { %1122 = vst.msk [vmem:[#allocation2] sm:$0xff] %vm1121_vm14, %v1119_v46 }
 0x773   : > { %v1123_v47 = vld [vmem:[#allocation2] sm:$0xff] }
 0x774   : > { %v1124_v48 = vpack.c.bf16 %v1123_v47, %v1123_v47 }
 0x776   : > { %1618 = vmatmul.msk.bf16.vlgmr.msrb.gmra.mxu0 %vm914_vm5, %v1124_v48 }
 0x7f3   : > { %v1157_v50 = vpop.f32.mrf.mxu0 }
 0x7f4   : > { %v1158_v51 = vadd.f32 %v1769_v49, %v1157_v50 }
 0x7f6   : > { %v2215_v52 = vadd.f32 %v1158_v51, %v2163_v23  ;;  %v1685_v23 = vld [vmem:[%s2135_s12 + $0x38] sm:$0xff] }
 0x7f7   : > { %1309 = vmatpush.bf16.msra.mxu3 %v1685_v23 }
 0x7f8   : > { %v1164_v53 = vsel %vm914_vm5, %v2215_v52, 0.0 }
 0x7f9   : > { %1165 = vadd.xlane.f32.xlu0 %v1164_v53 }
 0x7fb   : > { %v1159_v54 = vpop.f32.mrf.mxu0  ;;  %1310 = vmatpush.bf16.msra.mxu3 %v1684_v0 }
 0x7ff   : > { %1311 = vmatpush.bf16.msra.mxu3 %v1683_v15 }
 0x803   : > { %1312 = vmatpush.bf16.msra.mxu3 %v1682_v16 }
 0x807   : > { %1313 = vmatpush.bf16.msra.mxu3 %v1681_v17 }
 0x80b   : > { %1314 = vmatpush.bf16.msra.mxu3 %v1680_v18 }
 0x80f   : > { %1315 = vmatpush.bf16.msra.mxu3 %v1679_v19 }
 0x813   : > { %1316 = vmatpush.bf16.msra.mxu3 %v1678_v20 }
 0x86c   : > { %v1166_v55 = vpop.xlane.xlu0 %1165 }
 0x86d   : > { %v1167_v56 = vmul.f32 %v1166_v55, %v2167_v31 }
 0x86f   : > { %v1168_v57 = vsub.f32 %v2215_v52, %v1167_v56 }
 0x871   : > { %v1169_v58 = vmul.f32 %v1168_v57, %v1168_v57 }
 0x873   : > { %v1170_v59 = vsel %vm914_vm5, %v1169_v58, 0.0 }
 0x874   : > { %1171 = vadd.xlane.f32.xlu2 %v1170_v59 }
 0x8e7   : > { %v1172_v62 = vpop.xlane.xlu2 %1171 }
 0x8e8   : > { %v1173_v63 = vmul.f32 %v1172_v62, %v2167_v31 }
 0x8ea   : > { %v1174_v1 = vadd.f32 1e-05, %v1173_v63 }
 0x8ec   : > { %1786 = vrsqrt.f32 %v1174_v1  ;;  %vm1181_vm0 = vweird.f32 %v1174_v1 }
 0x8f2   : > { %v1787_v2 = vpop.eup %1786 }
 0x8f3   : > { %v1176_v3 = vmul.f32 %v1787_v2, %v1174_v1  ;;  %vm1182_vm15 = vweird.f32 %v1787_v2 }
 0x8f4   : > { %vm1183_vm1 = vmor %vm1181_vm0, %vm1182_vm15 }
 0x8f5   : > { %v1177_v4 = vmul.f32 %v1787_v2, %v1176_v3 }
 0x8f7   : > { %v1178_v5 = vmul.f32 0.5, %v1177_v4 }
 0x8f9   : > { %v1179_v6 = vsub.f32 1.5, %v1178_v5 }
 0x8fb   : > { %v1180_v7 = vmul.f32 %v1787_v2, %v1179_v6 }
 0x8fd   : > { %v1184_v9 = vsel %vm1183_vm1, %v1787_v2, %v1180_v7 }
 0x8fe   : > { %v1185_v10 = vmul.f32 %v1184_v9, %v1168_v57 }
 0x900   : > { %v1189_v12 = vmul.f32 %v1770_v8, %v1185_v10 }
 0x902   : > { %v1193_v13 = vadd.f32 %v1771_v11, %v1189_v12 }
 0x904   : > { %v1194_v14 = vpack.c.bf16 %v1193_v13, %v1193_v13 }
 0x906   : > { %1627 = vmatmul.msk.bf16.vlgmr.msrb.gmra.mxu1 %vm914_vm5, %v1194_v14 }
 0x983   : > { %v1227_v22 = vpop.f32.mrf.mxu1 }
 0x984   : > { %v1228_v24 = vadd.f32 %v1772_v21, %v1227_v22 }
 0x986   : > { %v1232_v25 = vmul.f32 %v1228_v24, %v1228_v24  ;;  %v1231_v33 = vmul.f32 0.5, %v1228_v24 }
 0x988   : > { %v1233_v26 = vmul.f32 %v1232_v25, %v1228_v24 }
 0x98a   : > { %v1234_v27 = vmul.f32 0.044715, %v1233_v26 }
 0x98b   : > { %v1229_v28 = vpop.f32.mrf.mxu1 }
 0x98c   : > { %v1235_v29 = vadd.f32 %v1234_v27, %v1228_v24 }
 0x98e   : > { %v1236_v30 = vmul.f32 0.7978846, %v1235_v29 }
 0x990   : > { %1788 = vtanh.f32 %v1236_v30 }
 0x996   : > { %v1789_v32 = vpop.eup %1788 }
 0x997   : > { %v1238_v34 = vadd.f32 1.0, %v1789_v32 }
 0x999   : > { %v1239_v35 = vmul.f32 %v1238_v34, %v1231_v33 }
 0x99b   : > { %v1240_v36 = vpack.c.bf16 %v1239_v35, %v1239_v35 }
 0x99d   : > { %1317 = vmatmul.bf16.vlgmr.msra.gmra.mxu3 %v1240_v36 }
 0xa20   : > { %v1318_v38 = vpop.f32.mrf.mxu3 }
 0xa21   : > { %v1319_v39 = vadd.f32 %v1773_v37, %v1318_v38 }
 0xa23   : > { %v1322_v40 = vadd.f32 %v1319_v39, %v2215_v52 }
 0xa24   : > { %1326 = sbr.rel (%p1660_p1) target bundleno = 2870 (0xb36), region = 108 }
 0xa28   : > { %v1320_v41 = vpop.f32.mrf.mxu3 }
 0xa29   : > { %v1329_v42 = vsel %vm914_vm5, %v1322_v40, 0.0  ;;  %v1790_v57 = vld [vmem:[%s2406_s3] ss:$0 sm:$0xff] }
 0xa2a   : > { %1330 = vadd.xlane.f32.xlu0 %v1329_v42 }
 0xa9d   : > { %v1331_v43 = vpop.xlane.xlu0 %1330 }
 0xa9e   : > { %v1332_v44 = vmul.f32 %v1331_v43, %v2167_v31 }
 0xaa0   : > { %v1333_v45 = vsub.f32 %v1322_v40, %v1332_v44 }
 0xaa2   : > { %v1334_v46 = vmul.f32 %v1333_v45, %v1333_v45 }
 0xaa4   : > { %v1335_v47 = vsel %vm914_vm5, %v1334_v46, 0.0 }
 0xaa5   : > { %1336 = vadd.xlane.f32.xlu0 %v1335_v47 }
 0xb18   : > { %v1337_v48 = vpop.xlane.xlu0 %1336 }
 0xb19   : > { %v1338_v49 = vmul.f32 %v1337_v48, %v2167_v31  ;;  %v1791_v31 = vld [vmem:[%s2407_s25] ss:$0 sm:$0xff] }
 0xb1b   : > { %v1339_v50 = vadd.f32 1e-05, %v1338_v49 }
 0xb1d   : > { %1792 = vrsqrt.f32 %v1339_v50  ;;  %vm1346_vm3 = vweird.f32 %v1339_v50 }
 0xb23   : > { %v1793_v51 = vpop.eup %1792 }
 0xb24   : > { %v1341_v52 = vmul.f32 %v1793_v51, %v1339_v50  ;;  %vm1347_vm2 = vweird.f32 %v1793_v51 }
 0xb25   : > { %vm1348_vm4 = vmor %vm1346_vm3, %vm1347_vm2 }
 0xb26   : > { %v1342_v53 = vmul.f32 %v1793_v51, %v1341_v52 }
 0xb28   : > { %v1343_v54 = vmul.f32 0.5, %v1342_v53 }
 0xb2a   : > { %v1344_v55 = vsub.f32 1.5, %v1343_v54 }
 0xb2c   : > { %v1345_v56 = vmul.f32 %v1793_v51, %v1344_v55 }
 0xb2e   : > { %v1349_v58 = vsel %vm1348_vm4, %v1793_v51, %v1345_v56 }
 0xb2f   : > { %v1350_v59 = vmul.f32 %v1349_v58, %v1333_v45 }
 0xb31   : > { %v1354_v60 = vmul.f32 %v1790_v57, %v1350_v59 }
 0xb33   : > { %v1358_v61 = vadd.f32 %v1791_v31, %v1354_v60 }
 0xb35   : > { %1359 = vst.msk [vmem:[%s2137_s18] sm:$0xff] %vm914_vm5, %v1358_v61 }
 0xb36 PF: > { %s2408_s5 = sld [smem:[#allocation9_spill]] }
 0xb3c   : > { %p1661_p2 = scmp.ge.s32.totalorder %s2408_s5, 1 }
 0xb3e   : > { %1363 = sbr.rel (%p1661_p2) target bundleno = 2884 (0xb44), region = 112 }
 0xb43   : > { %1364 = vst.msk [vmem:[%s2137_s18] sm:$0xff] %vm914_vm5, %v1322_v40 }
 0xb44 PF: > { %s2409_s23 = sld [smem:[#allocation10_spill]]  ;;  %s1378_s2 = sshll.u32 %s2137_s18, 4  ;;  %s1379_s2 = int_to_ptr.vmem [resolvable:$true] %s1378_s2 }
 0xb45   : > { %s2410_s21 = sld [smem:[#allocation7_spill]] }
 0xb46   : > { %s2412_s19 = sld [smem:[#allocation31_spill]] }
 0xb4a   : > { %s1663_s30 = sshll.u32 %s2409_s23, 3 }
 0xb4b   : > { %s2413_s12 = sand.u32 1, %s2410_s21  }
 0xb4c   : > { %s1376_s8 = scalar_lea.hbm %s2412_s19, %s1663_s30  ;;  %s1366_s29 = scalar_lea.sflag [#allocation4], %s2413_s12 }
 0xb4d   : > { %s1380_s24 = sshll.u32 %s1376_s8, 4  ;;  %s1814_s10 = scalar_lea.hbm %s2412_s19, 16  ;;  %s1381_s24 = int_to_ptr.hbm [resolvable:$true] %s1380_s24 }
 0xb4e   : > { %s1808_s16 = sshra.s32 %s1381_s24, 4  ;;  %s1809_s16 = int_to_ptr.hbm [resolvable:$true] %s1808_s16 }
 0xb4f   : > { %s1810_s0 = scalar_lea.hbm %s1809_s16, 8  ;;  %p1815_p7 = scmp.lt.s32.totalorder %s1809_s16, %s2412_s19 }
 0xb50   : > { %p1811_p4 = scmp.ne.s32.totalorder %s1809_s16, %s1810_s0  ;;  %p1816_p8 = scmp.lt.s32.totalorder %s1814_s10, %s1810_s0 }
 0xb52   : > { %p1812_p5 = pnand %p1811_p4, %p2051_p3  ;;  %p1817_p10 = por %p1816_p8, %p1815_p7 }
 0xb54   : > { %p1813_p6 = pneg %p1812_p5 }
 0xb56   : > { %p1818_p11 = pnand %p1817_p10, %p1813_p6 }
 0xb58   : > { %1821 = shalt.err (!%p1818_p11)
}
 0xb59   : > { %1686 = dma.vmem_to_hbm [thread:$0]  (%p2051_p3), %s1379_s2, 128, %s1381_s24, %s1366_s29  }
 0xb5a PF: > { %s2414_s18 = sld [smem:[#allocation13_spill]] }
 0xb5b   : > { %s2415_s5 = sld [smem:[#allocation6_spill]] }
 0xb60   : > { %p1692_p12 = scmp.ge.s32.totalorder %s2414_s18, 2 }
 0xb61   : > { %s1392_s21 = sand.u32 1, %s2415_s5  }
 0xb62   : > { %p1689_p13 = pnand %p1692_p12, %p2061_p9  ;;  %s1393_s30 = scalar_lea.sflag [#allocation4], %s1392_s21 }
 0xb64   : > { %p1690_p0 = pneg %p1689_p13 }
 0xb66   : > { %1855 = dma.done.wait (%p1690_p0), %s1393_s30, 128  }
 0xb67   : > { %1857 = vsyncadd (%p1690_p0), %s1393_s30, 4294967168  ;;  %s33_s4 = sadd.s32 1, %s2414_s18   ;;  %s2417_s1 = sld [smem:[#allocation7_spill]] }
 0xb68   : > { %p30_p1 = scmp.ge.s32.totalorder %s33_s4, 6   ;;  %s2418_s22 = sld [smem:[#allocation8_spill]] }
 0xb69   : > { %s2419_s23 = sld [smem:[#allocation18_spill]] }
 0xb6a   : > { %s2420_s24 = sld [smem:[#allocation11_spill]]  ;;  %32 = sbr.rel (!%p30_p1) target bundleno = 20 (0x14), region = 183 }
 0xb6b   : > { %s2421_s2 = sld [smem:[#allocation12_spill]] }
 0xb6c   : > { %s2422_s25 = sld [smem:[#allocation14_spill]] }
 0xb6d   : > { %s2423_s3 = sld [smem:[#allocation16_spill]] }
 0xb6e   : > { %2424 = sst [smem:[#allocation6_spill]] %s33_s4 }
 0xb6f   :  { %1399 = vsyncpa [#allocation4], 1 }
 0xb70   :  { %1401 = vsyncpa [#allocation4 + $0x1], 1 }

</bundles_post_ra>
